<compile_context>
chip_gen: v7x
topology: tpu7x:2x2x1
jax: 0.10.0
libtpu: 0.0.40
codegen_flags: <defaults>
</compile_context>

<pallas_src>
from functools import partial

import jax
import jax.numpy as jnp
import numpy as np
from jax.experimental import pallas as pl
from jax.experimental.pallas import tpu as pltpu

_LANE = 128          # pad classifier / species lanes to this
_MAX_BLOCK_B = 2048  # cap on batch-tile rows (VMEM-trivial on v5e/v6e/v7x)


def _round_up(x, m):
    return ((x + m - 1) // m) * m


def _vote_kernel(x_ref, wt_ref, b_ref, m_ref, idx_ref, *, num_species):
    # scores[b, k] = x_b . W_k + bias_k   (padded columns score exactly 0)
    scores = jnp.dot(x_ref[...], wt_ref[...],
                     preferred_element_type=jnp.float32) + b_ref[...]
    p = jax.nn.sigmoid(scores)                                     # [bt, NCp]
    # counts[b, s] = c0[s] + sum_k p[b,k] * (S - F)[s,k]
    # (c0 is folded into M via the first padded column, whose p is exactly 0.5)
    counts = jnp.dot(p, m_ref[...], preferred_element_type=jnp.float32)

    # Fused first-argmax over the real species lanes (padded lanes masked;
    # real counts are >= 0 so -1.0 can never win).
    nsp = counts.shape[-1]
    lane = jax.lax.broadcasted_iota(jnp.int32, counts.shape, 1)
    counts_m = jnp.where(lane < num_species, counts, -1.0)
    max_c = jnp.max(counts_m, axis=-1, keepdims=True)
    first_idx = jnp.min(jnp.where(counts_m == max_c, lane, nsp),
                        axis=-1, keepdims=True)                    # [bt, 1]
    idx_ref[...] = first_idx.astype(jnp.int32)


def prepare_params(W, b, F_mask, S_mask):
    """One-time fold + pad of the classifier parameters (all f32).

    Returns:
      wt    [D,  NCp]  transposed weights (padded columns are zero)
      b_row [1,  NCp]  bias row added in-kernel (padded entries zero)
      M     [NCp, NSp] vote matrix (S - F)^T with c0 folded into row NC
    """
    NC, D = W.shape
    NS = F_mask.shape[0]
    NCp = _round_up(NC + 1, _LANE)   # >= 1 spare column to carry c0
    NSp = _round_up(NS, _LANE)

    wt = jnp.pad(W.astype(jnp.float32), ((0, NCp - NC), (0, 0))).T     # [D, NCp]
    b_row = jnp.pad(b.astype(jnp.float32).reshape(1, NC),
                    ((0, 0), (0, NCp - NC)))                           # [1, NCp]

    M = (S_mask.astype(jnp.float32) - F_mask.astype(jnp.float32)).T    # [NC, NS]
    M = jnp.pad(M, ((0, NCp - NC), (0, NSp - NS)))                     # [NCp, NSp]
    # Fold c0 = rowsum(F): padded classifier column NC has score exactly 0,
    # so p = 0.5 and M[NC, s] = 2*c0[s] contributes exactly c0[s] per sample.
    c0 = F_mask.astype(jnp.float32).sum(axis=1)                        # [NS]
    M = M.at[NC, :NS].set(2.0 * c0)
    return wt, b_row, M


@partial(jax.jit, static_argnames=("num_species", "feature_dim"))
def multi_linear_forward(x, wt, b_row, M, *, num_species, feature_dim):
    """x: [B, 1, D] or [B, D] -> per-sample class index [B] int32."""
    D = feature_dim
    x2 = x.reshape(-1, D).astype(jnp.float32)
    B = x2.shape[0]
    NCp = wt.shape[1]
    NSp = M.shape[1]

    # Batch tiling: single fat tile for small B; >= 2 "parallel" grid steps
    # once B >= 256 (v7x megacore); cap tile rows to stay VMEM-friendly.
    if B >= 256:
        bt = min(_MAX_BLOCK_B, _round_up(pl.cdiv(B, 2), 8))
    else:
        bt = _round_up(B, 8)
    Bp = _round_up(B, bt)
    if Bp != B:
        x2 = jnp.pad(x2, ((0, Bp - B), (0, 0)))
    grid = Bp // bt

    flops = grid * (2 * bt * D * NCp + 2 * bt * NCp * NSp)
    bytes_accessed = 4 * (Bp * D + D * NCp + NCp + NCp * NSp + Bp)

    idx_p = pl.pallas_call(
        partial(_vote_kernel, num_species=num_species),
        out_shape=jax.ShapeDtypeStruct((Bp, 1), jnp.int32),
        grid=(grid,),
        in_specs=[
            pl.BlockSpec((bt, D), lambda i: (i, 0)),      # X, batch-tiled, full D
            pl.BlockSpec((D, NCp), lambda i: (0, 0)),     # W^T   (resident)
            pl.BlockSpec((1, NCp), lambda i: (0, 0)),     # bias row (resident)
            pl.BlockSpec((NCp, NSp), lambda i: (0, 0)),   # vote matrix (resident)
        ],
        out_specs=pl.BlockSpec((bt, 1), lambda i: (i, 0)),
        compiler_params=pltpu.CompilerParams(
            dimension_semantics=("parallel",)),
        cost_estimate=pl.CostEstimate(
            flops=flops,
            transcendentals=grid * bt * NCp,
            bytes_accessed=bytes_accessed),
    )(x2, wt, b_row, M)

    return idx_p[:B, 0]


if __name__ == "__main__":
    species_list = ["setosa", "versicolor", "virginica", "other"]
    NS = len(species_list)
    D = 32
    pairs = [(i, j) for i in range(NS) for j in range(i + 1, NS)]
    NC = len(pairs)                 # 6 pairwise one-vs-one classifiers
    B = 256                         # batched forward (amortizes launch cost)

    key = jax.random.PRNGKey(0)
    k_w, k_b, k_x = jax.random.split(key, 3)

    W = jax.random.normal(k_w, (NC, D), dtype=jnp.float32)    # stacked Theta_k
    b = jax.random.normal(k_b, (NC, 1), dtype=jnp.float32)    # stacked bias_k

    # Indicator matrices: F[s,k]=1 iff species s is the first of pair k,
    #                     S[s,k]=1 iff species s is the second of pair k.
    F_np = np.zeros((NS, NC), dtype=np.float32)
    S_np = np.zeros((NS, NC), dtype=np.float32)
    for k, (i, j) in enumerate(pairs):
        F_np[i, k] = 1.0
        S_np[j, k] = 1.0

    wt, b_row, M = prepare_params(W, b, jnp.asarray(F_np), jnp.asarray(S_np))

    # Inputs shaped like the PyTorch module's [batch, 1, dim].
    x = jax.random.normal(k_x, (B, 1, D), dtype=jnp.float32)

    idx = multi_linear_forward(x, wt, b_row, M,
                               num_species=NS, feature_dim=D)
    idx = jax.block_until_ready(idx)
    idx_np = np.asarray(idx)

    # Pure numpy reference of the voting math + first-argmax prediction.
    x2 = np.asarray(x).reshape(B, D)
    scores_ref = x2 @ np.asarray(W).T + np.asarray(b).reshape(1, NC)
    p_ref = 1.0 / (1.0 + np.exp(-scores_ref))                      # [B, NC]
    counts_ref = (1.0 - p_ref) @ F_np.T + p_ref @ S_np.T           # [B, NS]
    ref_idx = np.argmax(counts_ref, axis=-1).astype(np.int32)

    assert idx_np.shape == (B,)
    assert np.all((idx_np >= 0) & (idx_np < NS))
    mismatch = idx_np != ref_idx
    if mismatch.any():
        # Only tolerate disagreement where the reference itself is a near-tie.
        rows = np.where(mismatch)[0]
        top2 = np.sort(counts_ref[rows], axis=-1)[:, -2:]
        assert np.all(top2[:, 1] - top2[:, 0] < 1e-4), \
            "kernel argmax disagrees with reference beyond tie tolerance"

    # Species-name lookup stays host-side (single transfer at the very end),
    # mirroring the module's string return value.
    predicted = [species_list[int(i)] for i in idx_np[:4]]
    _ = predicted

    print("KERNEL_OK")
</pallas_src>

<mosaic_0001>
module attributes {stable_mosaic.version = 11 : i64} {
  func.func @_vote_kernel(%arg0: i32, %arg1: memref<128x32xf32, #tpu.memory_space<vmem>>, %arg2: memref<32x128xf32, #tpu.memory_space<vmem>>, %arg3: memref<1x128xf32, #tpu.memory_space<vmem>>, %arg4: memref<128x128xf32, #tpu.memory_space<vmem>>, %arg5: memref<128x1xi32, #tpu.memory_space<vmem>>) attributes {dimension_semantics = [#tpu.dimension_semantics<parallel>], iteration_bounds = array<i64: 2>, scalar_prefetch = 0 : i64, scratch_operands = 0 : i64, tpu.core_type = #tpu.core_type<tc>, window_params = [{transform_indices = @transform_0, window_bounds = array<i64: 128, 32>}, {pipeline_mode = #tpu.pipeline_mode<synchronous>, transform_indices = @transform_1, window_bounds = array<i64: 32, 128>}, {pipeline_mode = #tpu.pipeline_mode<synchronous>, transform_indices = @transform_2, window_bounds = array<i64: 1, 128>}, {pipeline_mode = #tpu.pipeline_mode<synchronous>, transform_indices = @transform_3, window_bounds = array<i64: 128, 128>}, {transform_indices = @transform_4, window_bounds = array<i64: 128, 1>}]} {
    %c0 = arith.constant 0 : index
    %c0_0 = arith.constant 0 : index
    %0 = vector.load %arg1[%c0, %c0_0] : memref<128x32xf32, #tpu.memory_space<vmem>>, vector<128x32xf32>
    %c0_1 = arith.constant 0 : index
    %c0_2 = arith.constant 0 : index
    %1 = vector.load %arg2[%c0_1, %c0_2] : memref<32x128xf32, #tpu.memory_space<vmem>>, vector<32x128xf32>
    %cst = arith.constant dense<0.000000e+00> : vector<128x128xf32>
    %2 = tpu.matmul %0, %1, %cst {dimension_numbers = #tpu.dot_dimension_numbers<[1], [0], [0], [1], [0, 0, 1, 1], [], []>} : vector<128x32xf32>, vector<32x128xf32>, vector<128x128xf32> -> vector<128x128xf32>
    %c0_3 = arith.constant 0 : index
    %c0_4 = arith.constant 0 : index
    %3 = vector.load %arg3[%c0_3, %c0_4] : memref<1x128xf32, #tpu.memory_space<vmem>>, vector<1x128xf32>
    %4 = vector.broadcast %3 : vector<1x128xf32> to vector<128x128xf32>
    %5 = arith.addf %2, %4 : vector<128x128xf32>
    %6 = arith.negf %5 : vector<128x128xf32>
    %7 = math.exp %6 : vector<128x128xf32>
    %cst_5 = arith.constant 1.000000e+00 : f32
    %8 = vector.broadcast %cst_5 : f32 to vector<128x128xf32>
    %9 = arith.addf %8, %7 : vector<128x128xf32>
    %10 = arith.divf %8, %9 : vector<128x128xf32>
    %c0_6 = arith.constant 0 : index
    %c0_7 = arith.constant 0 : index
    %11 = vector.load %arg4[%c0_6, %c0_7] : memref<128x128xf32, #tpu.memory_space<vmem>>, vector<128x128xf32>
    %cst_8 = arith.constant dense<0.000000e+00> : vector<128x128xf32>
    %12 = tpu.matmul %10, %11, %cst_8 {dimension_numbers = #tpu.dot_dimension_numbers<[1], [0], [0], [1], [0, 0, 1, 1], [], []>} : vector<128x128xf32>, vector<128x128xf32>, vector<128x128xf32> -> vector<128x128xf32>
    %13 = tpu.iota {dimensions = array<i32: 1>} : vector<128x128xi32>
    %c4_i32 = arith.constant 4 : i32
    %14 = vector.broadcast %c4_i32 : i32 to vector<128x128xi32>
    %15 = arith.cmpi slt, %13, %14 : vector<128x128xi32>
    %cst_9 = arith.constant -1.000000e+00 : f32
    %16 = vector.broadcast %cst_9 : f32 to vector<128x128xf32>
    %17 = arith.select %15, %12, %16 : vector<128x128xi1>, vector<128x128xf32>
    %cst_10 = arith.constant dense<0xFF800000> : vector<128xf32>
    %18 = vector.multi_reduction <maximumf>, %17, %cst_10 [1] : vector<128x128xf32> to vector<128xf32>
    %19 = vector.shape_cast %18 : vector<128xf32> to vector<128x1xf32>
    %20 = vector.broadcast %19 : vector<128x1xf32> to vector<128x128xf32>
    %21 = arith.cmpf oeq, %17, %20 : vector<128x128xf32>
    %c128_i32 = arith.constant 128 : i32
    %22 = vector.broadcast %c128_i32 : i32 to vector<128x128xi32>
    %23 = arith.select %21, %13, %22 : vector<128x128xi1>, vector<128x128xi32>
    %cst_11 = arith.constant dense<2147483647> : vector<128xi32>
    %24 = vector.multi_reduction <minsi>, %23, %cst_11 [1] : vector<128x128xi32> to vector<128xi32>
    %25 = vector.shape_cast %24 : vector<128xi32> to vector<128x1xi32>
    %c0_12 = arith.constant 0 : index
    %c0_13 = arith.constant 0 : index
    %26 = vector.load %arg5[%c0_12, %c0_13] : memref<128x1xi32, #tpu.memory_space<vmem>>, vector<128x1xi32>
    tpu.vector_store %arg5[%c0_12, %c0_13], %25 {strides = array<i32>} : memref<128x1xi32, #tpu.memory_space<vmem>>, vector<128x1xi32>,
    return
  }
  func.func @transform_0(%arg0: i32) -> (i32, i32) {
    %c0_i32 = arith.constant 0 : i32
    %c0_i32_0 = arith.constant 0 : i32
    return %arg0, %c0_i32 : i32, i32
  }
  func.func @transform_1(%arg0: i32) -> (i32, i32) {
    %c0_i32 = arith.constant 0 : i32
    %c0_i32_0 = arith.constant 0 : i32
    %c0_i32_1 = arith.constant 0 : i32
    return %c0_i32, %c0_i32_0 : i32, i32
  }
  func.func @transform_2(%arg0: i32) -> (i32, i32) {
    %c0_i32 = arith.constant 0 : i32
    %c0_i32_0 = arith.constant 0 : i32
    %c0_i32_1 = arith.constant 0 : i32
    return %c0_i32, %c0_i32_0 : i32, i32
  }
  func.func @transform_3(%arg0: i32) -> (i32, i32) {
    %c0_i32 = arith.constant 0 : i32
    %c0_i32_0 = arith.constant 0 : i32
    %c0_i32_1 = arith.constant 0 : i32
    return %c0_i32, %c0_i32_0 : i32, i32
  }
  func.func @transform_4(%arg0: i32) -> (i32, i32) {
    %c0_i32 = arith.constant 0 : i32
    %c0_i32_0 = arith.constant 0 : i32
    return %arg0, %c0_i32 : i32, i32
  }
}

</mosaic_0001>

<bundles_post_ra>
// kernel: multi_linear_forward.1
= control target key start
LH: loop header
LB: loop body
LE: loop exit
PB: predicated region body
PF: predicated region fallthrough
CT: control target
= control target key end

     0   :  { %s1404_s15 = smov 0   ;;  %s1860_s0 = inlined_call_operand.vmem [shape: f32[256,32], index: 0, kind: input, shape index: {}]   ;;  %s1861_s1 = inlined_call_operand.vmem [shape: f32[32,128], index: 1, kind: input, shape index: {}]   ;;  %s1862_s2 = inlined_call_operand.vmem [shape: f32[1,128], index: 2, kind: input, shape index: {}]   ;;  %s1863_s3 = inlined_call_operand.vmem [shape: f32[128,128], index: 3, kind: input, shape index: {}]   ;;  %s1864_s4 = inlined_call_operand.vmem [shape: s32[256,1], index: 4, kind: output, shape index: {}]  }
   0x1 LB: > { %s1059_s16 = sadd.s32 4294967295, %s1377_s15   ;;  %p1063_p0 = scmp.ge.s32.totalorder %s1377_s15, 1  ;;  %s1377_s15 = sphi %s1404_s15, %s14_s15  }
   0x2   : > { %p163_p1 = scmp.lt.s32.totalorder %s1377_s15, 3 }
   0x4   : > { %p164_p2 = pnand %p1063_p0, %p163_p1 }
   0x5   : > { %v217_v0 = vld [vmem:[%s1861_s1] sm:$0xff] (!%p164_p2)  ;;  %v218_v1 = vld [vmem:[%s1861_s1 + $0x8] sm:$0xff] (!%p164_p2)  ;;  %v219_v2 = vld [vmem:[%s1861_s1 + $0x10] sm:$0xff] (!%p164_p2)  ;;  %s1064_s23 = sshll.u32 (!%p164_p2), %s1059_s16, 4  ;;  %vm228_vm0 = vcmask (!%p164_p2), 261120  }
   0x6   : > { %167 = sbr.rel (%p164_p2) target bundleno = 945 (0x3b1), region = 36  ;;  %v1243_v3 = vpack.c.bf16 (!%p164_p2), %v218_v1, %v217_v0  ;;  %v220_v4 = vld [vmem:[%s1861_s1 + $0x18] sm:$0xff] (!%p164_p2)  ;;  %p190_p3 = scmp.lt.s32.totalorder (!%p164_p2), %s1064_s23, 31  ;;  %v518_v5 = vld [vmem:[%s1863_s3] sm:$0xff] (!%p164_p2)  ;;  %v519_v6 = vld [vmem:[%s1863_s3 + $0x8] sm:$0xff] (!%p164_p2) }
   0x7   : > { %v1247_v7 = vpack.c.bf16 (!%p164_p2), %v220_v4, %v219_v2  ;;  %v1251_v8 = vpack.c.bf16 (!%p164_p2), %v519_v6, %v518_v5  ;;  %v520_v25 = vld [vmem:[%s1863_s3 + $0x10] sm:$0xff] (!%p164_p2)  ;;  %v521_v26 = vld [vmem:[%s1863_s3 + $0x18] sm:$0xff] (!%p164_p2)  ;;  %v522_v28 = vld [vmem:[%s1863_s3 + $0x20] sm:$0xff] (!%p164_p2) }
   0x8   : > { %1244 = vmatprep.subr.bf16.mxu0 (!%p164_p2), %v1243_v3  ;;  %v1255_v27 = vpack.c.bf16 (!%p164_p2), %v521_v26, %v520_v25  ;;  %v523_v29 = vld [vmem:[%s1863_s3 + $0x28] sm:$0xff] (!%p164_p2)  ;;  %v524_v31 = vld [vmem:[%s1863_s3 + $0x30] sm:$0xff] (!%p164_p2)  ;;  %v525_v32 = vld [vmem:[%s1863_s3 + $0x38] sm:$0xff] (!%p164_p2) }
   0x9   : > { %1246 = vmatpush3.bf16.msra.mxu0 (!%p164_p2), %v1243_v3  ;;  %1283 = vmatprep.subr.bf16.mxu1 (!%p164_p2), %v1251_v8  ;;  %v1259_v30 = vpack.c.bf16 (!%p164_p2), %v523_v29, %v522_v28  ;;  %v1263_v33 = vpack.c.bf16 (!%p164_p2), %v525_v32, %v524_v31  ;;  %v526_v34 = vld [vmem:[%s1863_s3 + $0x40] sm:$0xff] (!%p164_p2)  ;;  %v527_v35 = vld [vmem:[%s1863_s3 + $0x48] sm:$0xff] (!%p164_p2)  ;;  %v528_v37 = vld [vmem:[%s1863_s3 + $0x50] sm:$0xff] (!%p164_p2) }
   0xa   : > { %1248 = vmatprep.subr.bf16.mxu0 (!%p164_p2), %v1247_v7  ;;  %1291 = vmatpush3.bf16.msra.mxu1 (!%p164_p2), %v1251_v8  ;;  %v1267_v36 = vpack.c.bf16 (!%p164_p2), %v527_v35, %v526_v34  ;;  %v529_v38 = vld [vmem:[%s1863_s3 + $0x58] sm:$0xff] (!%p164_p2)  ;;  %v530_v40 = vld [vmem:[%s1863_s3 + $0x60] sm:$0xff] (!%p164_p2)  ;;  %v531_v41 = vld [vmem:[%s1863_s3 + $0x68] sm:$0xff] (!%p164_p2) }
   0xb   : > { %1284 = vmatprep.subr.bf16.mxu1 (!%p164_p2), %v1255_v27  ;;  %v1271_v39 = vpack.c.bf16 (!%p164_p2), %v529_v38, %v528_v37  ;;  %v1275_v42 = vpack.c.bf16 (!%p164_p2), %v531_v41, %v530_v40  ;;  %v532_v43 = vld [vmem:[%s1863_s3 + $0x70] sm:$0xff] (!%p164_p2)  ;;  %v533_v44 = vld [vmem:[%s1863_s3 + $0x78] sm:$0xff] (!%p164_p2)  ;;  %v1517_v46 = vld [vmem:[%s1862_s2] ss:$0 sm:$0xff] (!%p164_p2) }
   0xc   : > { %v1279_v45 = vpack.c.bf16 (!%p164_p2), %v533_v44, %v532_v43 }
   0xd   : > { %s1866_s23 = smov (!%p190_p3, %s1064_s23), 31  ;;  %1250 = vmatpush3.bf16.msra.mxu0 %v1247_v7 }
   0xe   : > { %s1065_s30 = sshll.u32 %s1866_s23, 3  ;;  %1252 = vmatprep.subr.bf16.mxu0 %v1251_v8  ;;  %1292 = vmatpush3.bf16.msra.mxu1 %v1255_v27 }
   0xf   : > { %s1438_s7 = scalar_lea.vmem %s1860_s0, %s1065_s30  ;;  %1285 = vmatprep.subr.bf16.mxu1 %v1259_v30  ;;  %s1810_s18 = scalar_lea.vmem %s1864_s4, %s1065_s30 }
  0x10   : > { %v201_v9 = vld [vmem:[%s1438_s7] sm:$0xff]  ;;  %v202_v10 = vld [vmem:[%s1438_s7 + $0x8] sm:$0xff]  ;;  %v203_v11 = vld [vmem:[%s1438_s7 + $0x10] sm:$0xff] }
  0x11   : > { %1163 = vmatprep.mubr.msk.f32.mxu0 %vm228_vm0, %v201_v9  ;;  %v204_v12 = vld [vmem:[%s1438_s7 + $0x18] sm:$0xff]  ;;  %v205_v13 = vld [vmem:[%s1438_s7 + $0x20] sm:$0xff]  ;;  %v206_v14 = vld [vmem:[%s1438_s7 + $0x28] sm:$0xff] }
  0x12   : > { %1164 = vmatmul.mubr.msk.f32.vlgmr.msra.gmra.mrb[0].mxu0 %vm228_vm0, %v202_v10  ;;  %v207_v15 = vld [vmem:[%s1438_s7 + $0x30] sm:$0xff]  ;;  %v208_v16 = vld [vmem:[%s1438_s7 + $0x38] sm:$0xff]  ;;  %v209_v17 = vld [vmem:[%s1438_s7 + $0x40] sm:$0xff]  ;;  %1293 = vmatpush3.bf16.msra.mxu1 %v1259_v30 }
  0x13   : > { %1166 = vmatprep.mubr.msk.f32.mxu0 %vm228_vm0, %v203_v11  ;;  %1254 = vmatpush3.bf16.msra.mxu0 %v1251_v8  ;;  %v210_v18 = vld [vmem:[%s1438_s7 + $0x48] sm:$0xff]  ;;  %v211_v19 = vld [vmem:[%s1438_s7 + $0x50] sm:$0xff]  ;;  %v212_v20 = vld [vmem:[%s1438_s7 + $0x58] sm:$0xff] }
  0x14   : > { %v213_v21 = vld [vmem:[%s1438_s7 + $0x60] sm:$0xff]  ;;  %v214_v22 = vld [vmem:[%s1438_s7 + $0x68] sm:$0xff]  ;;  %v215_v23 = vld [vmem:[%s1438_s7 + $0x70] sm:$0xff]  ;;  %1256 = vmatprep.subr.bf16.mxu0 %v1255_v27  ;;  %1286 = vmatprep.subr.bf16.mxu1 %v1263_v33 }
  0x15   : > { %v216_v24 = vld [vmem:[%s1438_s7 + $0x78] sm:$0xff] }
  0x16   : > { %1167 = vmatmul.mubr.msk.f32.gmra.mrb[2].mxu0 %vm228_vm0, %v204_v12  ;;  %1294 = vmatpush3.bf16.msra.mxu1 %v1263_v33 }
  0x17   : > { %1169 = vmatprep.mubr.msk.f32.mxu0 %vm228_vm0, %v205_v13  ;;  %1258 = vmatpush3.bf16.msra.mxu0 %v1255_v27 }
  0x18   : > { %1260 = vmatprep.subr.bf16.mxu0 %v1259_v30  ;;  %1287 = vmatprep.subr.bf16.mxu1 %v1267_v36 }
  0x1a   : > { %1170 = vmatmul.mubr.msk.f32.gmra.mrb[4].mxu0 %vm228_vm0, %v206_v14  ;;  %1295 = vmatpush3.bf16.msra.mxu1 %v1267_v36 }
  0x1b   : > { %1172 = vmatprep.mubr.msk.f32.mxu0 %vm228_vm0, %v207_v15  ;;  %1262 = vmatpush3.bf16.msra.mxu0 %v1259_v30 }
  0x1c   : > { %1264 = vmatprep.subr.bf16.mxu0 %v1263_v33  ;;  %1288 = vmatprep.subr.bf16.mxu1 %v1271_v39 }
  0x1e   : > { %1173 = vmatmul.mubr.msk.f32.gmra.mrb[6].mxu0 %vm228_vm0, %v208_v16  ;;  %1296 = vmatpush3.bf16.msra.mxu1 %v1271_v39 }
  0x1f   : > { %1175 = vmatprep.mubr.msk.f32.mxu0 %vm228_vm0, %v209_v17  ;;  %1266 = vmatpush3.bf16.msra.mxu0 %v1263_v33 }
  0x20   : > { %1268 = vmatprep.subr.bf16.mxu0 %v1267_v36  ;;  %1289 = vmatprep.subr.bf16.mxu1 %v1275_v42 }
  0x22   : > { %1176 = vmatmul.mubr.msk.f32.gmra.mrb[8].mxu0 %vm228_vm0, %v210_v18  ;;  %1297 = vmatpush3.bf16.msra.mxu1 %v1275_v42 }
  0x23   : > { %1178 = vmatprep.mubr.msk.f32.mxu0 %vm228_vm0, %v211_v19  ;;  %1270 = vmatpush3.bf16.msra.mxu0 %v1267_v36 }
  0x24   : > { %1272 = vmatprep.subr.bf16.mxu0 %v1271_v39  ;;  %1290 = vmatprep.subr.bf16.mxu1 %v1279_v45 }
  0x26   : > { %1179 = vmatmul.mubr.msk.f32.gmra.mrb[10].mxu0 %vm228_vm0, %v212_v20  ;;  %1298 = vmatpush3.bf16.msra.mxu1 %v1279_v45 }
  0x27   : > { %1181 = vmatprep.mubr.msk.f32.mxu0 %vm228_vm0, %v213_v21  ;;  %1274 = vmatpush3.bf16.msra.mxu0 %v1271_v39 }
  0x28   : > { %1276 = vmatprep.subr.bf16.mxu0 %v1275_v42 }
  0x2a   : > { %1182 = vmatmul.mubr.msk.f32.gmra.mrb[12].mxu0 %vm228_vm0, %v214_v22 }
  0x2b   : > { %1184 = vmatprep.mubr.msk.f32.mxu0 %vm228_vm0, %v215_v23  ;;  %1278 = vmatpush3.bf16.msra.mxu0 %v1275_v42 }
  0x2c   : > { %1280 = vmatprep.subr.bf16.mxu0 %v1279_v45 }
  0x2e   : > { %1185 = vmatmul.mubr.msk.f32.gmra.mrb[14].mxu0 %vm228_vm0, %v216_v24 }
  0x2f   : > { %1282 = vmatpush3.bf16.msra.mxu0 %v1279_v45 }
  0xe5   : > { %v1165_v47 = vpop.f32.mrb[0].mxu0 }
  0xe6   : > { %v349_v48 = vadd.f32 %v1165_v47, %v1517_v46  ;;  %v343_v49 = vpop.f32.mrb[1].mxu0 }
  0xe7   : > { %v344_v50 = vadd.f32 %v1517_v46, %v343_v49 }
  0xe8   : > { %v1086_v51 = vmul.f32 -1.442695, %v349_v48 }
  0xe9   : > { %v1085_v52 = vmul.f32 -1.442695, %v344_v50  ;;  %v1168_v53 = vpop.f32.mrb[2].mxu0 }
  0xea   : > { %1307 = vpow2.f32 %v1086_v51  ;;  %v359_v54 = vadd.f32 %v1168_v53, %v1517_v46  ;;  %v353_v55 = vpop.f32.mrb[3].mxu0 }
  0xeb   : > { %1309 = vpow2.f32 %v1085_v52  ;;  %v354_v56 = vadd.f32 %v1517_v46, %v353_v55 }
  0xec   : > { %v1088_v57 = vmul.f32 -1.442695, %v359_v54 }
  0xed   : > { %v1087_v58 = vmul.f32 -1.442695, %v354_v56  ;;  %v1171_v59 = vpop.f32.mrb[4].mxu0 }
  0xee   : > { %1311 = vpow2.f32 %v1088_v57  ;;  %v369_v60 = vadd.f32 %v1171_v59, %v1517_v46  ;;  %v363_v61 = vpop.f32.mrb[5].mxu0 }
  0xef   : > { %1313 = vpow2.f32 %v1087_v58  ;;  %v364_v62 = vadd.f32 %v1517_v46, %v363_v61 }
  0xf0   : > { %v1090_v63 = vmul.f32 -1.442695, %v369_v60 }
  0xf1   : > { %v1089_v0 = vmul.f32 -1.442695, %v364_v62  ;;  %v1174_v1 = vpop.f32.mrb[6].mxu0 }
  0xf2   : > { %1315 = vpow2.f32 %v1090_v63  ;;  %v379_v2 = vadd.f32 %v1174_v1, %v1517_v46  ;;  %v373_v3 = vpop.f32.mrb[7].mxu0 }
  0xf3   : > { %1317 = vpow2.f32 %v1089_v0  ;;  %v374_v4 = vadd.f32 %v1517_v46, %v373_v3 }
  0xf4   : > { %v1308_v5 = vpop.eup %1307  ;;  %v1092_v6 = vmul.f32 -1.442695, %v379_v2 }
  0xf5   : > { %v1310_v7 = vpop.eup %1309  ;;  %v471_v8 = vadd.f32 1.0, %v1308_v5  ;;  %v1091_v9 = vmul.f32 -1.442695, %v374_v4  ;;  %v1177_v10 = vpop.f32.mrb[8].mxu0 }
  0xf6   : > { %v470_v11 = vadd.f32 1.0, %v1310_v7  ;;  %1319 = vpow2.f32 %v1092_v6  ;;  %v389_v12 = vadd.f32 %v1177_v10, %v1517_v46  ;;  %v383_v13 = vpop.f32.mrb[9].mxu0 }
  0xf7   : > { %1321 = vrcp.f32 %v471_v8  ;;  %v384_v14 = vadd.f32 %v1517_v46, %v383_v13 }
  0xf8   : > { %v1312_v15 = vpop.eup %1311  ;;  %1323 = vrcp.f32 %v470_v11  ;;  %v1094_v16 = vmul.f32 -1.442695, %v389_v12 }
  0xf9   : > { %v1314_v17 = vpop.eup %1313  ;;  %v473_v18 = vadd.f32 1.0, %v1312_v15  ;;  %1325 = vpow2.f32 %v1091_v9  ;;  %v1093_v19 = vmul.f32 -1.442695, %v384_v14  ;;  %v1180_v20 = vpop.f32.mrb[10].mxu0  ;;  %v679_v15 = vlaneseq }
  0xfa   : > { %v472_v21 = vadd.f32 1.0, %v1314_v17  ;;  %1327 = vpow2.f32 %v1094_v16  ;;  %v399_v22 = vadd.f32 %v1180_v20, %v1517_v46  ;;  %v393_v23 = vpop.f32.mrb[11].mxu0 }
  0xfb   : > { %1329 = vrcp.f32 %v473_v18  ;;  %v394_v24 = vadd.f32 %v1517_v46, %v393_v23  ;;  %v1535_v16 = vand.u32 127, %v679_v15 }
  0xfc   : > { %v1316_v25 = vpop.eup %1315  ;;  %1331 = vrcp.f32 %v472_v21  ;;  %v1096_v26 = vmul.f32 -1.442695, %v399_v22 }
  0xfd   : > { %v1318_v27 = vpop.eup %1317  ;;  %v475_v28 = vadd.f32 1.0, %v1316_v25  ;;  %1333 = vpow2.f32 %v1093_v19  ;;  %v1095_v29 = vmul.f32 -1.442695, %v394_v24  ;;  %v1183_v30 = vpop.f32.mrb[12].mxu0  ;;  %vm681_vm1 = vcmp.lt.s32.totalorder %v1535_v16, 4 }
  0xfe   : > { %v474_v31 = vadd.f32 1.0, %v1318_v27  ;;  %1335 = vpow2.f32 %v1096_v26  ;;  %v409_v32 = vadd.f32 %v1183_v30, %v1517_v46  ;;  %v403_v33 = vpop.f32.mrb[13].mxu0 }
  0xff   : > { %1337 = vrcp.f32 %v475_v28  ;;  %v404_v34 = vadd.f32 %v1517_v46, %v403_v33 }
 0x100   : > { %v1320_v35 = vpop.eup %1319  ;;  %1339 = vrcp.f32 %v474_v31  ;;  %v1098_v36 = vmul.f32 -1.442695, %v409_v32 }
 0x101   : > { %v1322_v37 = vpop.eup %1321  ;;  %1341 = vpow2.f32 %v1095_v29  ;;  %v1097_v38 = vmul.f32 -1.442695, %v404_v34  ;;  %v1186_v39 = vpop.f32.mrb[14].mxu0  ;;  %v477_v41 = vadd.f32 1.0, %v1320_v35 }
 0x102   : > { %v1324_v40 = vpop.eup %1323  ;;  %v419_v42 = vadd.f32 %v1186_v39, %v1517_v46  ;;  %v413_v43 = vpop.f32.mrb[15].mxu0  ;;  %1343 = vpow2.f32 %v1098_v36 }
 0x103   : > { %v1326_v44 = vpop.eup %1325  ;;  %v414_v45 = vadd.f32 %v1517_v46, %v413_v43  ;;  %1219 = vmatprep.mubr.f32.mxu0 %v1324_v40  ;;  %1345 = vpow2.f32 %v1097_v38 }
 0x104   : > { %v1328_v47 = vpop.eup %1327  ;;  %v1100_v48 = vmul.f32 -1.442695, %v419_v42  ;;  %1220 = vmatmul.mubr.f32.vlgmr.msra.gmra.mrb[16].mxu0 %v1322_v37  ;;  %v476_v51 = vadd.f32 1.0, %v1326_v44  ;;  %1347 = vrcp.f32 %v477_v41 }
 0x105   : > { %v1330_v49 = vpop.eup %1329  ;;  %v1099_v50 = vmul.f32 -1.442695, %v414_v45  ;;  %v479_v55 = vadd.f32 1.0, %v1328_v47 }
 0x106   : > { %v1332_v52 = vpop.eup %1331  ;;  %1349 = vpow2.f32 %v1100_v48 }
 0x107   : > { %v1334_v53 = vpop.eup %1333  ;;  %1222 = vmatprep.mubr.f32.mxu0 %v1332_v52  ;;  %1351 = vpow2.f32 %v1099_v50 }
 0x108   : > { %v1336_v54 = vpop.eup %1335  ;;  %v478_v56 = vadd.f32 1.0, %v1334_v53  ;;  %1223 = vmatmul.mubr.f32.gmra.mrb[18].mxu0 %v1330_v49  ;;  %1353 = vrcp.f32 %v476_v51 }
 0x109   : > { %v1338_v57 = vpop.eup %1337  ;;  %v481_v59 = vadd.f32 1.0, %v1336_v54 }
 0x10a   : > { %v1340_v46 = vpop.eup %1339  ;;  %1355 = vrcp.f32 %v478_v56 }
 0x10b   : > { %v1342_v58 = vpop.eup %1341  ;;  %1225 = vmatprep.mubr.f32.mxu0 %v1340_v46  ;;  %1357 = vrcp.f32 %v479_v55 }
 0x10c   : > { %v480_v60 = vadd.f32 1.0, %v1342_v58  ;;  %1226 = vmatmul.mubr.f32.gmra.mrb[20].mxu0 %v1338_v57  ;;  %v1344_v61 = vpop.eup %1343 }
 0x10d   : > { %v1346_v62 = vpop.eup %1345  ;;  %v483_v1 = vadd.f32 1.0, %v1344_v61 }
 0x10e   : > { %1359 = vrcp.f32 %v480_v60  ;;  %v482_v63 = vadd.f32 1.0, %v1346_v62  ;;  %v1348_v0 = vpop.eup %1347 }
 0x10f   : > { %1361 = vrcp.f32 %v481_v59 }
 0x110   : > { %v1350_v2 = vpop.eup %1349  ;;  %1363 = vrcp.f32 %v482_v63 }
 0x111   : > { %v1352_v3 = vpop.eup %1351  ;;  %1365 = vrcp.f32 %v483_v1  ;;  %v485_v7 = vadd.f32 1.0, %v1350_v2 }
 0x112   : > { %v1354_v4 = vpop.eup %1353  ;;  %v484_v5 = vadd.f32 1.0, %v1352_v3 }
 0x113   : > { %1228 = vmatprep.mubr.f32.mxu1 %v1354_v4 }
 0x114   : > { %v1356_v6 = vpop.eup %1355  ;;  %1367 = vrcp.f32 %v484_v5  ;;  %1229 = vmatmul.mubr.f32.vlgmr.msra.gmra.mrb[0].mxu1 %v1348_v0 }
 0x115   : > { %v1358_v8 = vpop.eup %1357  ;;  %1231 = vmatprep.mubr.f32.mxu1 %v1356_v6  ;;  %1369 = vrcp.f32 %v485_v7 }
 0x118   : > { %v1360_v9 = vpop.eup %1359  ;;  %1232 = vmatmul.mubr.f32.gmra.mrb[2].mxu1 %v1358_v8 }
 0x119   : > { %v1362_v10 = vpop.eup %1361  ;;  %1234 = vmatprep.mubr.f32.mxu1 %v1360_v9 }
 0x11a   : > { %v1364_v11 = vpop.eup %1363 }
 0x11b   : > { %v1366_v12 = vpop.eup %1365 }
 0x11c   : > { %1235 = vmatmul.mubr.f32.gmra.mrb[4].mxu1 %v1362_v10 }
 0x11d   : > { %1237 = vmatprep.mubr.f32.mxu1 %v1364_v11 }
 0x11e   : > { %v1368_v13 = vpop.eup %1367 }
 0x11f   : > { %v1370_v14 = vpop.eup %1369 }
 0x120   : > { %1238 = vmatmul.mubr.f32.gmra.mrb[6].mxu1 %v1366_v12 }
 0x121   : > { %1240 = vmatprep.mubr.f32.mxu1 %v1368_v13 }
 0x124   : > { %1241 = vmatmul.mubr.f32.gmra.mrb[8].mxu1 %v1370_v14 }
 0x1d7   : > { %v1221_v17 = vpop.f32.mrb[16].mxu0 }
 0x1d8   : > { %v600_v18 = vpop.f32.mrb[17].mxu0  ;;  %v683_v19 = vsel %vm681_vm1, %v1221_v17, -1.0 }
 0x1d9   : > { %700 = vmax.xlane.f32.xlu0 %v683_v19  ;;  %v682_v22 = vsel %vm681_vm1, %v600_v18, -1.0 }
 0x1db   : > { %v1224_v20 = vpop.f32.mrb[18].mxu0 }
 0x1dc   : > { %v610_v21 = vpop.f32.mrb[19].mxu0  ;;  %v685_v23 = vsel %vm681_vm1, %v1224_v20, -1.0 }
 0x1dd   : > { %698 = vmax.xlane.f32.xlu0 %v682_v22  ;;  %704 = vmax.xlane.f32.xlu1 %v685_v23  ;;  %v684_v26 = vsel %vm681_vm1, %v610_v21, -1.0 }
 0x1df   : > { %v1227_v24 = vpop.f32.mrb[20].mxu0 }
 0x1e0   : > { %v620_v25 = vpop.f32.mrb[21].mxu0  ;;  %v687_v28 = vsel %vm681_vm1, %v1227_v24, -1.0 }
 0x1e1   : > { %702 = vmax.xlane.f32.xlu1 %v684_v26  ;;  %v686_v27 = vsel %vm681_vm1, %v620_v25, -1.0 }
 0x1e2   : > { %706 = vmax.xlane.f32.xlu0 %v686_v27 }
 0x1e5   : > { %708 = vmax.xlane.f32.xlu1 %v687_v28 }
 0x1e7   : > { %v1230_v29 = vpop.f32.mrb[0].mxu1 }
 0x1e8   : > { %v630_v30 = vpop.f32.mrb[1].mxu1  ;;  %v1552_v31 = vsel %vm681_vm1, %v1230_v29, -1.0 }
 0x1e9   : > { %v1556_v32 = vsel %vm681_vm1, %v630_v30, -1.0  ;;  %712 = vmax.xlane.f32.xlu1 %v1552_v31 }
 0x1ea   : > { %710 = vmax.xlane.f32.xlu0 %v1556_v32 }
 0x1eb   : > { %v1233_v33 = vpop.f32.mrb[2].mxu1 }
 0x1ec   : > { %v640_v34 = vpop.f32.mrb[3].mxu1  ;;  %v1562_v35 = vsel %vm681_vm1, %v1233_v33, -1.0 }
 0x1ed   : > { %v1566_v36 = vsel %vm681_vm1, %v640_v34, -1.0  ;;  %716 = vmax.xlane.f32.xlu1 %v1562_v35 }
 0x1ee   : > { %714 = vmax.xlane.f32.xlu0 %v1566_v36 }
 0x1ef   : > { %v1236_v37 = vpop.f32.mrb[4].mxu1 }
 0x1f0   : > { %v650_v38 = vpop.f32.mrb[5].mxu1  ;;  %v1572_v39 = vsel %vm681_vm1, %v1236_v37, -1.0 }
 0x1f1   : > { %v1576_v40 = vsel %vm681_vm1, %v650_v38, -1.0  ;;  %720 = vmax.xlane.f32.xlu1 %v1572_v39 }
 0x1f2   : > { %718 = vmax.xlane.f32.xlu0 %v1576_v40 }
 0x1f3   : > { %v1239_v41 = vpop.f32.mrb[6].mxu1 }
 0x1f4   : > { %v660_v42 = vpop.f32.mrb[7].mxu1  ;;  %v1582_v43 = vsel %vm681_vm1, %v1239_v41, -1.0 }
 0x1f5   : > { %v1586_v44 = vsel %vm681_vm1, %v660_v42, -1.0  ;;  %724 = vmax.xlane.f32.xlu1 %v1582_v43 }
 0x1f6   : > { %722 = vmax.xlane.f32.xlu0 %v1586_v44 }
 0x1f7   : > { %v1242_v45 = vpop.f32.mrb[8].mxu1 }
 0x1f8   : > { %v670_v47 = vpop.f32.mrb[9].mxu1  ;;  %v1592_v48 = vsel %vm681_vm1, %v1242_v45, -1.0 }
 0x1f9   : > { %v1596_v49 = vsel %vm681_vm1, %v670_v47, -1.0  ;;  %728 = vmax.xlane.f32.xlu1 %v1592_v48 }
 0x1fa   : > { %726 = vmax.xlane.f32.xlu0 %v1596_v49 }
 0x266   : > { %v701_v50 = vpop.xlane.xlu0 %700 }
 0x267   : > { %vm731_vm2 = vcmp.eq.f32.partialorder %v683_v19, %v701_v50 }
 0x268   : > { %v1601_v51 = vsel %vm731_vm2, %v1535_v16, 128 }
 0x269   : > { %v777_v52 = vshra.s32 %v1601_v51, 16 }
 0x26a   : > { %v699_v53 = vpop.xlane.xlu0 %698  ;;  %v705_v54 = vpop.xlane.xlu1 %704 }
 0x26b   : > { %vm730_vm3 = vcmp.eq.f32.partialorder %v682_v22, %v699_v53  ;;  %vm733_vm4 = vcmp.eq.f32.partialorder %v685_v23, %v705_v54  ;;  %v1604_v55 = vcvt.s32.f32 %v777_v52 }
 0x26c   : > { %v1607_v56 = vsel %vm730_vm3, %v1535_v16, 128  ;;  %v1610_v57 = vsel %vm733_vm4, %v1535_v16, 128 }
 0x26d   : > { %780 = vmin.xlane.f32.xlu1 %v1604_v55  ;;  %v805_v46 = vshra.s32 %v1610_v57, 16  ;;  %v763_v58 = vshra.s32 %v1607_v56, 16  ;;  %v804_v53 = vand.u32 65535, %v1610_v57 }
 0x26e   : > { %v703_v59 = vpop.xlane.xlu1 %702 }
 0x26f   : > { %vm732_vm5 = vcmp.eq.f32.partialorder %v684_v26, %v703_v59  ;;  %v707_v60 = vpop.xlane.xlu0 %706  ;;  %v1615_v61 = vcvt.s32.f32 %v805_v46  ;;  %v1617_v62 = vcvt.s32.f32 %v763_v58 }
 0x270   : > { %v1620_v63 = vsel %vm732_vm5, %v1535_v16, 128  ;;  %vm734_vm6 = vcmp.eq.f32.partialorder %v686_v27, %v707_v60 }
 0x271   : > { %v1623_v0 = vsel %vm734_vm6, %v1535_v16, 128  ;;  %808 = vmin.xlane.f32.xlu1 %v1615_v61  ;;  %766 = vmin.xlane.f32.xlu0 %v1617_v62  ;;  %v791_v1 = vshra.s32 %v1620_v63, 16  ;;  %v790_v59 = vand.u32 65535, %v1620_v63 }
 0x272   : > { %v709_v2 = vpop.xlane.xlu1 %708  ;;  %v819_v4 = vshra.s32 %v1623_v0, 16 }
 0x273   : > { %vm735_vm7 = vcmp.eq.f32.partialorder %v687_v28, %v709_v2  ;;  %v1628_v3 = vcvt.s32.f32 %v791_v1  ;;  %v806_v2 = vcvt.s32.f32 %v804_v53 }
 0x274   : > { %v1632_v5 = vsel %vm735_vm7, %v1535_v16, 128  ;;  %v1638_v9 = vcvt.s32.f32 %v819_v4 }
 0x275   : > { %794 = vmin.xlane.f32.xlu0 %v1628_v3  ;;  %v833_v6 = vshra.s32 %v1632_v5, 16  ;;  %v832_v63 = vand.u32 65535, %v1632_v5 }
 0x276   : > { %v713_v7 = vpop.xlane.xlu1 %712 }
 0x277   : > { %v1636_v8 = vcvt.s32.f32 %v833_v6  ;;  %v711_v10 = vpop.xlane.xlu0 %710  ;;  %vm737_vm8 = vcmp.eq.f32.partialorder %v1552_v31, %v713_v7  ;;  %v792_v6 = vcvt.s32.f32 %v790_v59 }
 0x278   : > { %vm736_vm9 = vcmp.eq.f32.partialorder %v1556_v32, %v711_v10  ;;  %v1643_v11 = vsel %vm737_vm8, %v1535_v16, 128 }
 0x279   : > { %836 = vmin.xlane.f32.xlu1 %v1636_v8  ;;  %822 = vmin.xlane.f32.xlu0 %v1638_v9  ;;  %v1648_v12 = vsel %vm736_vm9, %v1535_v16, 128  ;;  %v861_v13 = vshra.s32 %v1643_v11, 16 }
 0x27a   : > { %v717_v14 = vpop.xlane.xlu1 %716  ;;  %v847_v15 = vshra.s32 %v1648_v12, 16 }
 0x27b   : > { %v715_v17 = vpop.xlane.xlu0 %714  ;;  %vm739_vm10 = vcmp.eq.f32.partialorder %v1562_v35, %v717_v14  ;;  %v1653_v18 = vcvt.s32.f32 %v861_v13  ;;  %v860_v14 = vand.u32 65535, %v1643_v11 }
 0x27c   : > { %vm738_vm11 = vcmp.eq.f32.partialorder %v1566_v36, %v715_v17  ;;  %v1657_v19 = vsel %vm739_vm10, %v1535_v16, 128  ;;  %v1659_v20 = vcvt.s32.f32 %v847_v15 }
 0x27d   : > { %v1662_v21 = vsel %vm738_vm11, %v1535_v16, 128  ;;  %864 = vmin.xlane.f32.xlu1 %v1653_v18  ;;  %v889_v22 = vshra.s32 %v1657_v19, 16  ;;  %v888_v15 = vand.u32 65535, %v1657_v19 }
 0x27e   : > { %850 = vmin.xlane.f32.xlu0 %v1659_v20  ;;  %v721_v23 = vpop.xlane.xlu1 %720  ;;  %v875_v24 = vshra.s32 %v1662_v21, 16 }
 0x27f   : > { %v719_v25 = vpop.xlane.xlu0 %718  ;;  %vm741_vm12 = vcmp.eq.f32.partialorder %v1572_v39, %v721_v23  ;;  %v1669_v26 = vcvt.s32.f32 %v889_v22  ;;  %v862_v22 = vcvt.s32.f32 %v860_v14  ;;  %v874_v23 = vand.u32 65535, %v1662_v21 }
 0x280   : > { %vm740_vm13 = vcmp.eq.f32.partialorder %v1576_v40, %v719_v25  ;;  %v1673_v27 = vsel %vm741_vm12, %v1535_v16, 128  ;;  %v1675_v28 = vcvt.s32.f32 %v875_v24  ;;  %v890_v25 = vcvt.s32.f32 %v888_v15 }
 0x281   : > { %v1678_v29 = vsel %vm740_vm13, %v1535_v16, 128  ;;  %892 = vmin.xlane.f32.xlu1 %v1669_v26  ;;  %v917_v30 = vshra.s32 %v1673_v27, 16  ;;  %v916_v24 = vand.u32 65535, %v1673_v27 }
 0x282   : > { %878 = vmin.xlane.f32.xlu0 %v1675_v28  ;;  %v725_v31 = vpop.xlane.xlu1 %724  ;;  %v903_v32 = vshra.s32 %v1678_v29, 16  ;;  %v902_v21 = vand.u32 65535, %v1678_v29 }
 0x283   : > { %v723_v33 = vpop.xlane.xlu0 %722  ;;  %vm743_vm14 = vcmp.eq.f32.partialorder %v1582_v43, %v725_v31  ;;  %v1685_v34 = vcvt.s32.f32 %v917_v30 }
 0x284   : > { %vm742_vm15 = vcmp.eq.f32.partialorder %v1586_v44, %v723_v33  ;;  %v1689_v35 = vsel %vm743_vm14, %v1535_v16, 128  ;;  %v1691_v36 = vcvt.s32.f32 %v903_v32  ;;  %v918_v33 = vcvt.s32.f32 %v916_v24 }
 0x285   : > { %v1694_v37 = vsel %vm742_vm15, %v1535_v16, 128  ;;  %920 = vmin.xlane.f32.xlu1 %v1685_v34  ;;  %v945_v38 = vshra.s32 %v1689_v35, 16  ;;  %v944_v27 = vand.u32 65535, %v1689_v35 }
 0x286   : > { %906 = vmin.xlane.f32.xlu0 %v1691_v36  ;;  %v729_v39 = vpop.xlane.xlu1 %728  ;;  %v931_v40 = vshra.s32 %v1694_v37, 16  ;;  %v930_v29 = vand.u32 65535, %v1694_v37 }
 0x287   : > { %v727_v41 = vpop.xlane.xlu0 %726  ;;  %vm745_vm0 = vcmp.eq.f32.partialorder %v1592_v48, %v729_v39  ;;  %v1701_v42 = vcvt.s32.f32 %v945_v38 }
 0x288   : > { %vm744_vm1 = vcmp.eq.f32.partialorder %v1596_v49, %v727_v41  ;;  %v1705_v43 = vsel %vm745_vm0, %v1535_v16, 128  ;;  %v1707_v44 = vcvt.s32.f32 %v931_v40  ;;  %v776_v49 = vand.u32 65535, %v1601_v51 }
 0x289   : > { %v1710_v45 = vsel %vm744_vm1, %v1535_v16, 128  ;;  %948 = vmin.xlane.f32.xlu1 %v1701_v42  ;;  %v973_v47 = vshra.s32 %v1705_v43, 16  ;;  %v762_v16 = vand.u32 65535, %v1607_v56  ;;  %v972_v35 = vand.u32 65535, %v1705_v43 }
 0x28a   : > { %934 = vmin.xlane.f32.xlu0 %v1707_v44  ;;  %v959_v48 = vshra.s32 %v1710_v45, 16  ;;  %v778_v46 = vcvt.s32.f32 %v776_v49  ;;  %v946_v41 = vcvt.s32.f32 %v944_v27  ;;  %v958_v37 = vand.u32 65535, %v1710_v45 }
 0x28b   : > { %v1716_v50 = vcvt.s32.f32 %v973_v47  ;;  %v764_v51 = vcvt.s32.f32 %v762_v16  ;;  %v974_v49 = vcvt.s32.f32 %v972_v35 }
 0x28c   : > { %v1718_v52 = vcvt.s32.f32 %v959_v48  ;;  %v960_v45 = vcvt.s32.f32 %v958_v37 }
 0x28d   : > { %976 = vmin.xlane.f32.xlu1 %v1716_v50 }
 0x28e   : > { %962 = vmin.xlane.f32.xlu0 %v1718_v52 }
 0x2fa   : > { %v1725_v54 = vpop.xlane.xlu1 %780 }
 0x2fb   : > { %vm782_vm2 = vcmp.eq.f32.partialorder %v1604_v55, %v1725_v54  ;;  %v818_v55 = vand.u32 65535, %v1623_v0  ;;  %v846_v0 = vand.u32 65535, %v1648_v12 }
 0x2fc   : > { %v783_v58 = vsel %vm782_vm2, %v778_v46, inf  ;;  %vm986_vm2 = vcmask 7168  }
 0x2fd   : > { %784 = vmin.xlane.f32.xlu1 %v783_v58  ;;  %v820_v13 = vcvt.s32.f32 %v818_v55 }
 0x2fe   : > { %v1730_v60 = vpop.xlane.xlu1 %808  ;;  %v1732_v1 = vpop.xlane.xlu0 %766 }
 0x2ff   : > { %vm810_vm3 = vcmp.eq.f32.partialorder %v1615_v61, %v1730_v60  ;;  %vm768_vm4 = vcmp.eq.f32.partialorder %v1617_v62, %v1732_v1  ;;  %v834_v62 = vcvt.s32.f32 %v832_v63  ;;  %v815_v46 = vcvt.f32.s32 %v1730_v60 }
 0x300   : > { %v811_v56 = vsel %vm810_vm3, %v806_v2, inf  ;;  %v769_v57 = vsel %vm768_vm4, %v764_v51, inf  ;;  %v773_v2 = vcvt.f32.s32 %v1732_v1 }
 0x301   : > { %812 = vmin.xlane.f32.xlu1 %v811_v56  ;;  %770 = vmin.xlane.f32.xlu0 %v769_v57 }
 0x302   : > { %v1740_v4 = vpop.xlane.xlu0 %794  ;;  %v774_v60 = vshll.u32 %v773_v2, 16 }
 0x303   : > { %vm796_vm5 = vcmp.eq.f32.partialorder %v1628_v3, %v1740_v4  ;;  %v801_v57 = vcvt.f32.s32 %v1740_v4 }
 0x304   : > { %v797_v7 = vsel %vm796_vm5, %v792_v6, inf }
 0x305   : > { %798 = vmin.xlane.f32.xlu0 %v797_v7 }
 0x306   : > { %v1744_v61 = vpop.xlane.xlu1 %836  ;;  %v1746_v10 = vpop.xlane.xlu0 %822 }
 0x307   : > { %vm838_vm6 = vcmp.eq.f32.partialorder %v1636_v8, %v1744_v61  ;;  %vm824_vm7 = vcmp.eq.f32.partialorder %v1638_v9, %v1746_v10  ;;  %v848_v8 = vcvt.s32.f32 %v846_v0  ;;  %v829_v14 = vcvt.f32.s32 %v1746_v10 }
 0x308   : > { %v839_v5 = vsel %vm838_vm6, %v834_v62, inf  ;;  %v825_v3 = vsel %vm824_vm7, %v820_v13, inf  ;;  %v802_v62 = vshll.u32 %v801_v57, 16  ;;  %v843_v13 = vcvt.f32.s32 %v1744_v61 }
 0x309   : > { %840 = vmin.xlane.f32.xlu1 %v839_v5  ;;  %826 = vmin.xlane.f32.xlu0 %v825_v3 }
 0x30a   : > { %v1755_v17 = vpop.xlane.xlu1 %864  ;;  %v844_v15 = vshll.u32 %v843_v13, 16 }
 0x30b   : > { %v1758_v11 = vpop.xlane.xlu0 %850  ;;  %vm866_vm8 = vcmp.eq.f32.partialorder %v1653_v18, %v1755_v17  ;;  %v876_v18 = vcvt.s32.f32 %v874_v23  ;;  %v871_v61 = vcvt.f32.s32 %v1755_v17 }
 0x30c   : > { %v867_v9 = vsel %vm866_vm8, %v862_v22, inf  ;;  %vm852_vm9 = vcmp.eq.f32.partialorder %v1659_v20, %v1758_v11  ;;  %v830_v22 = vshll.u32 %v829_v14, 16  ;;  %v857_v10 = vcvt.f32.s32 %v1758_v11 }
 0x30d   : > { %868 = vmin.xlane.f32.xlu1 %v867_v9  ;;  %v853_v12 = vsel %vm852_vm9, %v848_v8, inf }
 0x30e   : > { %854 = vmin.xlane.f32.xlu0 %v853_v12  ;;  %v1765_v19 = vpop.xlane.xlu1 %892 }
 0x30f   : > { %v1768_v30 = vpop.xlane.xlu0 %878  ;;  %vm894_vm10 = vcmp.eq.f32.partialorder %v1669_v26, %v1765_v19  ;;  %v904_v26 = vcvt.s32.f32 %v902_v21  ;;  %v899_v21 = vcvt.f32.s32 %v1765_v19 }
 0x310   : > { %v895_v31 = vsel %vm894_vm10, %v890_v25, inf  ;;  %vm880_vm11 = vcmp.eq.f32.partialorder %v1675_v28, %v1768_v30  ;;  %v872_v25 = vshll.u32 %v871_v61, 16  ;;  %v885_v27 = vcvt.f32.s32 %v1768_v30 }
 0x311   : > { %896 = vmin.xlane.f32.xlu1 %v895_v31  ;;  %v881_v20 = vsel %vm880_vm11, %v876_v18, inf }
 0x312   : > { %882 = vmin.xlane.f32.xlu0 %v881_v20  ;;  %v1775_v32 = vpop.xlane.xlu1 %920  ;;  %v858_v20 = vshll.u32 %v857_v10, 16  ;;  %v886_v19 = vshll.u32 %v885_v27, 16 }
 0x313   : > { %v1778_v38 = vpop.xlane.xlu0 %906  ;;  %vm922_vm12 = vcmp.eq.f32.partialorder %v1685_v34, %v1775_v32  ;;  %v932_v34 = vcvt.s32.f32 %v930_v29 }
 0x314   : > { %v923_v39 = vsel %vm922_vm12, %v918_v33, inf  ;;  %vm908_vm13 = vcmp.eq.f32.partialorder %v1691_v36, %v1778_v38 }
 0x315   : > { %924 = vmin.xlane.f32.xlu1 %v923_v39  ;;  %v909_v28 = vsel %vm908_vm13, %v904_v26, inf  ;;  %v900_v26 = vshll.u32 %v899_v21, 16  ;;  %v927_v39 = vcvt.f32.s32 %v1775_v32 }
 0x316   : > { %910 = vmin.xlane.f32.xlu0 %v909_v28  ;;  %v1785_v40 = vpop.xlane.xlu1 %948 }
 0x317   : > { %v1788_v47 = vpop.xlane.xlu0 %934  ;;  %vm950_vm14 = vcmp.eq.f32.partialorder %v1701_v42, %v1785_v40 }
 0x318   : > { %v951_v48 = vsel %vm950_vm14, %v946_v41, inf  ;;  %vm936_vm15 = vcmp.eq.f32.partialorder %v1707_v44, %v1788_v47  ;;  %v787_v44 = vcvt.f32.s32 %v1725_v54  ;;  %v913_v41 = vcvt.f32.s32 %v1778_v38 }
 0x319   : > { %952 = vmin.xlane.f32.xlu1 %v951_v48  ;;  %v937_v36 = vsel %vm936_vm15, %v932_v34, inf }
 0x31a   : > { %938 = vmin.xlane.f32.xlu0 %v937_v36  ;;  %v1794_v43 = vpop.xlane.xlu1 %976  ;;  %v788_v59 = vshll.u32 %v787_v44, 16  ;;  %v928_v36 = vshll.u32 %v927_v39, 16 }
 0x31b   : > { %v1796_v16 = vpop.xlane.xlu0 %962  ;;  %vm978_vm0 = vcmp.eq.f32.partialorder %v1716_v50, %v1794_v43  ;;  %v983_v2 = vcvt.f32.s32 %v1794_v43 }
 0x31c   : > { %v979_v53 = vsel %vm978_vm0, %v974_v49, inf  ;;  %vm964_vm1 = vcmp.eq.f32.partialorder %v1718_v52, %v1796_v16  ;;  %v816_v52 = vshll.u32 %v815_v46, 16  ;;  %v955_v49 = vcvt.f32.s32 %v1785_v40 }
 0x31d   : > { %980 = vmin.xlane.f32.xlu1 %v979_v53  ;;  %v965_v42 = vsel %vm964_vm1, %v960_v45, inf  ;;  %v914_v53 = vshll.u32 %v913_v41, 16  ;;  %v984_v57 = vshll.u32 %v983_v2, 16 }
 0x31e   : > { %966 = vmin.xlane.f32.xlu0 %v965_v42  ;;  %v941_v42 = vcvt.f32.s32 %v1788_v47 }
 0x38a   : > { %v785_v58 = vpop.xlane.xlu1 %784 }
 0x38b   : > { %v786_v51 = vcvt.f32.s32 %v785_v58 }
 0x38d   : > { %v789_v50 = vadd.s32 %v788_v59, %v786_v51  ;;  %v956_v59 = vshll.u32 %v955_v49, 16 }
 0x38e   : > { %v813_v54 = vpop.xlane.xlu1 %812  ;;  %v771_v56 = vpop.xlane.xlu0 %770 }
 0x38f   : > { %988 = vst.msk [vmem:[%s1810_s18 + $0x8] sm:$0xff] %vm986_vm2, %v789_v50  ;;  %v814_v1 = vcvt.f32.s32 %v813_v54  ;;  %v772_v55 = vcvt.f32.s32 %v771_v56  ;;  %v942_v50 = vshll.u32 %v941_v42, 16 }
 0x391   : > { %v817_v63 = vadd.s32 %v816_v52, %v814_v1  ;;  %v775_v6 = vadd.s32 %v774_v60, %v772_v55  ;;  %v969_v52 = vcvt.f32.s32 %v1796_v16 }
 0x392   : > { %v799_v7 = vpop.xlane.xlu0 %798 }
 0x393   : > { %990 = vst.msk [vmem:[%s1810_s18 + $0x18] sm:$0xff] %vm986_vm2, %v817_v63  ;;  %987 = vst.msk [vmem:[%s1810_s18] sm:$0xff] %vm986_vm2, %v775_v6  ;;  %v800_v4 = vcvt.f32.s32 %v799_v7  ;;  %v970_v55 = vshll.u32 %v969_v52, 16 }
 0x395   : > { %v803_v0 = vadd.s32 %v802_v62, %v800_v4 }
 0x396   : > { %v841_v5 = vpop.xlane.xlu1 %840  ;;  %v827_v3 = vpop.xlane.xlu0 %826 }
 0x397   : > { %989 = vst.msk [vmem:[%s1810_s18 + $0x10] sm:$0xff] %vm986_vm2, %v803_v0  ;;  %v842_v23 = vcvt.f32.s32 %v841_v5  ;;  %v828_v8 = vcvt.f32.s32 %v827_v3 }
 0x399   : > { %v845_v9 = vadd.s32 %v844_v15, %v842_v23  ;;  %v831_v12 = vadd.s32 %v830_v22, %v828_v8 }
 0x39a   : > { %v869_v24 = vpop.xlane.xlu1 %868 }
 0x39b   : > { %992 = vst.msk [vmem:[%s1810_s18 + $0x28] sm:$0xff] %vm986_vm2, %v845_v9  ;;  %991 = vst.msk [vmem:[%s1810_s18 + $0x20] sm:$0xff] %vm986_vm2, %v831_v12  ;;  %v870_v18 = vcvt.f32.s32 %v869_v24  ;;  %v855_v31 = vpop.xlane.xlu0 %854 }
 0x39c   : > { %v856_v17 = vcvt.f32.s32 %v855_v31 }
 0x39d   : > { %v873_v33 = vadd.s32 %v872_v25, %v870_v18 }
 0x39e   : > { %v859_v11 = vadd.s32 %v858_v20, %v856_v17  ;;  %v897_v29 = vpop.xlane.xlu1 %896 }
 0x39f   : > { %994 = vst.msk [vmem:[%s1810_s18 + $0x38] sm:$0xff] %vm986_vm2, %v873_v33  ;;  %v898_v28 = vcvt.f32.s32 %v897_v29  ;;  %v883_v35 = vpop.xlane.xlu0 %882 }
 0x3a0   : > { %993 = vst.msk [vmem:[%s1810_s18 + $0x30] sm:$0xff] %vm986_vm2, %v859_v11  ;;  %v884_v37 = vcvt.f32.s32 %v883_v35 }
 0x3a1   : > { %v901_v30 = vadd.s32 %v900_v26, %v898_v28 }
 0x3a2   : > { %v887_v34 = vadd.s32 %v886_v19, %v884_v37  ;;  %v925_v48 = vpop.xlane.xlu1 %924 }
 0x3a3   : > { %996 = vst.msk [vmem:[%s1810_s18 + $0x48] sm:$0xff] %vm986_vm2, %v901_v30  ;;  %v926_v32 = vcvt.f32.s32 %v925_v48  ;;  %v911_v45 = vpop.xlane.xlu0 %910 }
 0x3a4   : > { %995 = vst.msk [vmem:[%s1810_s18 + $0x40] sm:$0xff] %vm986_vm2, %v887_v34  ;;  %v912_v38 = vcvt.f32.s32 %v911_v45 }
 0x3a5   : > { %v929_v44 = vadd.s32 %v928_v36, %v926_v32 }
 0x3a6   : > { %v915_v46 = vadd.s32 %v914_v53, %v912_v38  ;;  %v953_v58 = vpop.xlane.xlu1 %952 }
 0x3a7   : > { %998 = vst.msk [vmem:[%s1810_s18 + $0x58] sm:$0xff] %vm986_vm2, %v929_v44  ;;  %v954_v40 = vcvt.f32.s32 %v953_v58  ;;  %v939_v51 = vpop.xlane.xlu0 %938 }
 0x3a8   : > { %997 = vst.msk [vmem:[%s1810_s18 + $0x50] sm:$0xff] %vm986_vm2, %v915_v46  ;;  %v940_v47 = vcvt.f32.s32 %v939_v51 }
 0x3a9   : > { %v957_v54 = vadd.s32 %v956_v59, %v954_v40 }
 0x3aa   : > { %v943_v56 = vadd.s32 %v942_v50, %v940_v47  ;;  %v981_v60 = vpop.xlane.xlu1 %980 }
 0x3ab   : > { %1000 = vst.msk [vmem:[%s1810_s18 + $0x68] sm:$0xff] %vm986_vm2, %v957_v54  ;;  %v982_v43 = vcvt.f32.s32 %v981_v60  ;;  %v967_v1 = vpop.xlane.xlu0 %966 }
 0x3ac   : > { %999 = vst.msk [vmem:[%s1810_s18 + $0x60] sm:$0xff] %vm986_vm2, %v943_v56  ;;  %v968_v63 = vcvt.f32.s32 %v967_v1 }
 0x3ad   : > { %v985_v6 = vadd.s32 %v984_v57, %v982_v43 }
 0x3ae   : > { %v971_v7 = vadd.s32 %v970_v55, %v968_v63 }
 0x3af   : > { %1002 = vst.msk [vmem:[%s1810_s18 + $0x78] sm:$0xff] %vm986_vm2, %v985_v6 }
 0x3b0   : > { %1001 = vst.msk [vmem:[%s1810_s18 + $0x70] sm:$0xff] %vm986_vm2, %v971_v7 }
 0x3b1 PF: > { %s14_s15 = sadd.s32 1, %s1377_s15  }
 0x3b2   : > { %p11_p4 = scmp.ge.s32.totalorder %s14_s15, 4  }
 0x3b4   :  { %13 = sbr.rel (!%p11_p4) target bundleno = 1 (0x1), region = 66 }

</bundles_post_ra>
